<compile_context>
chip_gen: v6e
topology: v6e:2x2x1
jax: 0.10.0
libtpu: 0.0.40
codegen_flags: <defaults>
</compile_context>

<pallas_src>
import functools
import math

import jax
import jax.numpy as jnp
from jax import lax
from jax.experimental import pallas as pl
from jax.experimental.pallas import tpu as pltpu

EMBED_DIM = 256
H1 = 64
H2 = 16
OUT = 1

_SQRT_HALF = 1.0 / math.sqrt(2.0)


def _gelu_exact(x):
    # Matches PyTorch nn.GELU() default (approximate='none'): exact erf GELU.
    return 0.5 * x * (1.0 + lax.erf(x * _SQRT_HALF))


def _gelu_tanh(x):
    # tanh approximation: transcendental runs on the EUP (its own VLIW slot),
    # keeping the kernel on the memory roofline once x is streamed as bf16.
    return jax.nn.gelu(x, approximate=True)


def _mlp_kernel(x_ref, w1_ref, b1_ref, w2_ref, b2_ref, w3r_ref, b3_ref, o_ref,
                *, gelu):
    # x_ref:   (bm, E)   batch tile (f32 or bf16)
    # w1_ref:  (E, 64)   b1_ref: (1, 64)
    # w2_ref:  (64, 16)  b2_ref: (1, 16)
    # w3r_ref: (1, 16)   transposed last-layer weight   b3_ref: (1, 1)
    # o_ref:   (bm, 1)
    x = x_ref[...]  # MXU consumes x/W1 natively (bf16 or f32); acc stays f32

    h1 = jnp.dot(x, w1_ref[...], preferred_element_type=jnp.float32) + b1_ref[...]
    h1 = gelu(h1)

    h2 = jnp.dot(h1, w2_ref[...], preferred_element_type=jnp.float32) + b2_ref[...]
    h2 = gelu(h2)

    # Linear(16 -> 1) as VPU multiply + lane reduction (no 1-column MXU pass).
    h3 = jnp.sum(h2 * w3r_ref[...], axis=-1, keepdims=True) + b3_ref[...]
    o_ref[...] = jax.nn.sigmoid(h3).astype(o_ref.dtype)


def _round_up(n, m):
    return ((n + m - 1) // m) * m


@functools.lru_cache(maxsize=1)
def _num_tensorcores_per_chip():
    """Best-effort TC-per-chip query (v7x=2, v5e/v6e=1). Defaults to 1."""
    try:
        info = pltpu.get_tpu_info()
        for attr in ("num_cores", "num_tensorcores", "tensor_core_count",
                     "cores_per_chip"):
            n = getattr(info, attr, None)
            if isinstance(n, int) and n > 0:
                return n
    except Exception:
        pass
    try:
        kind = jax.devices()[0].device_kind.lower()
        if "v7" in kind or "7x" in kind:
            return 2
    except Exception:
        pass
    return 1


def _default_block_m(batch, num_cores):
    # Multi-TC (v7x): aim for >= 2 tiles per TensorCore so dimension_semantics
    # ("parallel",) shards the batch axis AND each core still double-buffers.
    # Single-TC (v5e/v6e): no forced split -- the grid is a serial loop there.
    min_steps = 2 * num_cores if num_cores > 1 else 1
    bm = pl.cdiv(batch, min_steps)
    bm = _round_up(max(bm, 16), 16)  # multiple of 16 covers bf16 (16,128) tiles
    return min(bm, 2048)             # 2 MiB f32 tile; 4 MiB double-buffered


@functools.partial(jax.jit, static_argnames=("block_m", "approximate_gelu"))
def tweet_regressor_forward(x, params, *, block_m=None, approximate_gelu=False):
    """x: (B, EMBED_DIM) float32 or bfloat16. Returns (B, 1) float32."""
    B, E = x.shape
    assert E == EMBED_DIM
    assert x.dtype in (jnp.float32, jnp.bfloat16)

    if block_m is None:
        block_m = _default_block_m(B, _num_tensorcores_per_chip())
    row_align = 16 if x.dtype == jnp.bfloat16 else 8
    assert block_m % row_align == 0, (
        f"block_m must be a multiple of {row_align} for dtype {x.dtype}")

    w1, b1, w2, b2, w3, b3 = params
    # Stream x in the caller-provided dtype; cast only the tiny W1 to match so
    # the first matmul feeds the MXU natively (accumulation stays f32).
    w1 = w1.astype(x.dtype)
    w2 = w2.astype(jnp.float32)
    # Biases as (1, n) rows so they broadcast over the batch tile in-kernel.
    b1 = b1.reshape(1, H1).astype(jnp.float32)
    b2 = b2.reshape(1, H2).astype(jnp.float32)
    b3 = b3.reshape(1, OUT).astype(jnp.float32)
    # Last-layer weight as a (1, 16) lane row for the VPU reduction.
    w3r = w3.reshape(H2, OUT).T.astype(jnp.float32)

    # Ragged batch: Pallas masks the partial last block (OOB output stores are
    # dropped), so no wrapper-side pad / extra HBM pass over x.
    grid = (pl.cdiv(B, block_m),)

    # Weights/biases are tiny: give every grid step the full (untiled) block
    # with a constant index_map so they stay VMEM-resident.
    def full(shape):
        return pl.BlockSpec(shape, lambda i: tuple(0 for _ in shape))

    gelu = _gelu_tanh if approximate_gelu else _gelu_exact

    out = pl.pallas_call(
        functools.partial(_mlp_kernel, gelu=gelu),
        out_shape=jax.ShapeDtypeStruct((B, OUT), jnp.float32),
        grid_spec=pltpu.PrefetchScalarGridSpec(
            num_scalar_prefetch=0,
            grid=grid,
            in_specs=[
                pl.BlockSpec((block_m, E), lambda i: (i, 0)),  # x tile
                full((E, H1)), full((1, H1)),
                full((H1, H2)), full((1, H2)),
                full((1, H2)), full((1, OUT)),
            ],
            out_specs=pl.BlockSpec((block_m, OUT), lambda i: (i, 0)),
        ),
        compiler_params=pltpu.CompilerParams(
            dimension_semantics=("parallel",)),
    )(x, w1, b1, w2, b2, w3r, b3)

    return out


def init_params(key):
    """Deterministic init mimicking nn.Linear default (uniform +/- 1/sqrt(fan_in))."""
    ks = jax.random.split(key, 6)

    def linear(kw, kb, fan_in, fan_out):
        bound = 1.0 / math.sqrt(fan_in)
        w = jax.random.uniform(kw, (fan_in, fan_out), jnp.float32, -bound, bound)
        b = jax.random.uniform(kb, (fan_out,), jnp.float32, -bound, bound)
        return w, b

    w1, b1 = linear(ks[0], ks[1], EMBED_DIM, H1)
    w2, b2 = linear(ks[2], ks[3], H1, H2)
    w3, b3 = linear(ks[4], ks[5], H2, OUT)
    return (w1, b1, w2, b2, w3, b3)


def _reference_forward(x, params):
    w1, b1, w2, b2, w3, b3 = params
    x = x.astype(jnp.float32)
    h = jax.nn.gelu(x @ w1 + b1, approximate=False)
    h = jax.nn.gelu(h @ w2 + b2, approximate=False)
    return jax.nn.sigmoid(h @ w3 + b3)


if __name__ == "__main__":
    key = jax.random.PRNGKey(0)
    k_params, k_x = jax.random.split(key)

    params = init_params(k_params)
    x = jax.random.normal(k_x, (48, EMBED_DIM), dtype=jnp.float32)

    # 1) Default heuristic, aligned batch.
    x16 = x[:16]
    out16 = jax.block_until_ready(tweet_regressor_forward(x16, params))
    ref16 = _reference_forward(x16, params)
    assert out16.shape == (16, 1)
    assert jnp.allclose(out16, ref16, atol=1e-5, rtol=1e-5), "f32 mismatch (B=16)"

    # 2) Ragged batch -> partial last block handled by the grid (no pad).
    x13 = x[:13]
    out13 = jax.block_until_ready(tweet_regressor_forward(x13, params))
    ref13 = _reference_forward(x13, params)
    assert out13.shape == (13, 1)
    assert jnp.allclose(out13, ref13, atol=1e-5, rtol=1e-5), "f32 mismatch (B=13, ragged)"

    # 3) Multi-step grid with a ragged last block (explicit small tile).
    x40 = x[:40]
    out40 = jax.block_until_ready(tweet_regressor_forward(x40, params, block_m=16))
    ref40 = _reference_forward(x40, params)
    assert out40.shape == (40, 1)
    assert jnp.allclose(out40, ref40, atol=1e-5, rtol=1e-5), "f32 mismatch (B=40, grid=3)"

    # 4) bf16 x stream supplied by the "producer" (no wrapper-side cast pass).
    x16_bf16 = x16.astype(jnp.bfloat16)
    out_bf16 = jax.block_until_ready(
        tweet_regressor_forward(x16_bf16, params, approximate_gelu=True))
    assert out_bf16.shape == (16, 1)
    assert jnp.allclose(out_bf16, ref16, atol=2e-2, rtol=2e-2), "bf16 mismatch vs reference"

    print("KERNEL_OK")
</pallas_src>

<mosaic_0001>
module attributes {stable_mosaic.version = 11 : i64} {
  func.func @_mlp_kernel(%arg0: i32, %arg1: memref<16x256xf32, #tpu.memory_space<vmem>>, %arg2: memref<256x64xf32, #tpu.memory_space<vmem>>, %arg3: memref<1x64xf32, #tpu.memory_space<vmem>>, %arg4: memref<64x16xf32, #tpu.memory_space<vmem>>, %arg5: memref<1x16xf32, #tpu.memory_space<vmem>>, %arg6: memref<1x16xf32, #tpu.memory_space<vmem>>, %arg7: memref<1x1xf32, #tpu.memory_space<vmem>>, %arg8: memref<16x1xf32, #tpu.memory_space<vmem>>) attributes {dimension_semantics = [#tpu.dimension_semantics<parallel>], iteration_bounds = array<i64: 1>, scalar_prefetch = 0 : i64, scratch_operands = 0 : i64, tpu.core_type = #tpu.core_type<tc>, window_params = [{transform_indices = @transform_0, window_bounds = array<i64: 16, 256>}, {pipeline_mode = #tpu.pipeline_mode<synchronous>, transform_indices = @transform_1, window_bounds = array<i64: 256, 64>}, {pipeline_mode = #tpu.pipeline_mode<synchronous>, transform_indices = @transform_2, window_bounds = array<i64: 1, 64>}, {pipeline_mode = #tpu.pipeline_mode<synchronous>, transform_indices = @transform_3, window_bounds = array<i64: 64, 16>}, {pipeline_mode = #tpu.pipeline_mode<synchronous>, transform_indices = @transform_4, window_bounds = array<i64: 1, 16>}, {pipeline_mode = #tpu.pipeline_mode<synchronous>, transform_indices = @transform_5, window_bounds = array<i64: 1, 16>}, {pipeline_mode = #tpu.pipeline_mode<synchronous>, transform_indices = @transform_6, window_bounds = array<i64: 1, 1>}, {transform_indices = @transform_7, window_bounds = array<i64: 16, 1>}]} {
    %c0 = arith.constant 0 : index
    %c0_0 = arith.constant 0 : index
    %0 = vector.load %arg1[%c0, %c0_0] : memref<16x256xf32, #tpu.memory_space<vmem>>, vector<16x256xf32>
    %c0_1 = arith.constant 0 : index
    %c0_2 = arith.constant 0 : index
    %1 = vector.load %arg2[%c0_1, %c0_2] : memref<256x64xf32, #tpu.memory_space<vmem>>, vector<256x64xf32>
    %cst = arith.constant dense<0.000000e+00> : vector<16x64xf32>
    %2 = tpu.matmul %0, %1, %cst {dimension_numbers = #tpu.dot_dimension_numbers<[1], [0], [0], [1], [0, 0, 1, 1], [], []>} : vector<16x256xf32>, vector<256x64xf32>, vector<16x64xf32> -> vector<16x64xf32>
    %c0_3 = arith.constant 0 : index
    %c0_4 = arith.constant 0 : index
    %3 = vector.load %arg3[%c0_3, %c0_4] : memref<1x64xf32, #tpu.memory_space<vmem>>, vector<1x64xf32>
    %4 = vector.broadcast %3 : vector<1x64xf32> to vector<16x64xf32>
    %5 = arith.addf %2, %4 : vector<16x64xf32>
    %cst_5 = arith.constant 5.000000e-01 : f32
    %6 = vector.broadcast %cst_5 : f32 to vector<16x64xf32>
    %7 = arith.mulf %6, %5 : vector<16x64xf32>
    %cst_6 = arith.constant 0.707106769 : f32
    %8 = vector.broadcast %cst_6 : f32 to vector<16x64xf32>
    %9 = arith.mulf %5, %8 : vector<16x64xf32>
    %10 = math.erf %9 : vector<16x64xf32>
    %cst_7 = arith.constant 1.000000e+00 : f32
    %11 = vector.broadcast %cst_7 : f32 to vector<16x64xf32>
    %12 = arith.addf %11, %10 : vector<16x64xf32>
    %13 = arith.mulf %7, %12 : vector<16x64xf32>
    %c0_8 = arith.constant 0 : index
    %c0_9 = arith.constant 0 : index
    %14 = vector.load %arg4[%c0_8, %c0_9] : memref<64x16xf32, #tpu.memory_space<vmem>>, vector<64x16xf32>
    %cst_10 = arith.constant dense<0.000000e+00> : vector<16x16xf32>
    %15 = tpu.matmul %13, %14, %cst_10 {dimension_numbers = #tpu.dot_dimension_numbers<[1], [0], [0], [1], [0, 0, 1, 1], [], []>} : vector<16x64xf32>, vector<64x16xf32>, vector<16x16xf32> -> vector<16x16xf32>
    %c0_11 = arith.constant 0 : index
    %c0_12 = arith.constant 0 : index
    %16 = vector.load %arg5[%c0_11, %c0_12] : memref<1x16xf32, #tpu.memory_space<vmem>>, vector<1x16xf32>
    %17 = vector.broadcast %16 : vector<1x16xf32> to vector<16x16xf32>
    %18 = arith.addf %15, %17 : vector<16x16xf32>
    %cst_13 = arith.constant 5.000000e-01 : f32
    %19 = vector.broadcast %cst_13 : f32 to vector<16x16xf32>
    %20 = arith.mulf %19, %18 : vector<16x16xf32>
    %cst_14 = arith.constant 0.707106769 : f32
    %21 = vector.broadcast %cst_14 : f32 to vector<16x16xf32>
    %22 = arith.mulf %18, %21 : vector<16x16xf32>
    %23 = math.erf %22 : vector<16x16xf32>
    %cst_15 = arith.constant 1.000000e+00 : f32
    %24 = vector.broadcast %cst_15 : f32 to vector<16x16xf32>
    %25 = arith.addf %24, %23 : vector<16x16xf32>
    %26 = arith.mulf %20, %25 : vector<16x16xf32>
    %c0_16 = arith.constant 0 : index
    %c0_17 = arith.constant 0 : index
    %27 = vector.load %arg6[%c0_16, %c0_17] : memref<1x16xf32, #tpu.memory_space<vmem>>, vector<1x16xf32>
    %28 = vector.broadcast %27 : vector<1x16xf32> to vector<16x16xf32>
    %29 = arith.mulf %26, %28 : vector<16x16xf32>
    %cst_18 = arith.constant dense<0.000000e+00> : vector<16xf32>
    %30 = vector.multi_reduction <add>, %29, %cst_18 [1] : vector<16x16xf32> to vector<16xf32>
    %31 = vector.shape_cast %30 : vector<16xf32> to vector<16x1xf32>
    %c0_19 = arith.constant 0 : index
    %c0_20 = arith.constant 0 : index
    %32 = vector.load %arg7[%c0_19, %c0_20] : memref<1x1xf32, #tpu.memory_space<vmem>>, vector<1x1xf32>
    %33 = vector.broadcast %32 : vector<1x1xf32> to vector<16x1xf32>
    %34 = arith.addf %31, %33 : vector<16x1xf32>
    %35 = arith.negf %34 : vector<16x1xf32>
    %36 = math.exp %35 : vector<16x1xf32>
    %cst_21 = arith.constant 1.000000e+00 : f32
    %37 = vector.broadcast %cst_21 : f32 to vector<16x1xf32>
    %38 = arith.addf %37, %36 : vector<16x1xf32>
    %39 = arith.divf %37, %38 : vector<16x1xf32>
    %c0_22 = arith.constant 0 : index
    %c0_23 = arith.constant 0 : index
    %40 = vector.load %arg8[%c0_22, %c0_23] : memref<16x1xf32, #tpu.memory_space<vmem>>, vector<16x1xf32>
    tpu.vector_store %arg8[%c0_22, %c0_23], %39 {strides = array<i32>} : memref<16x1xf32, #tpu.memory_space<vmem>>, vector<16x1xf32>,
    return
  }
  func.func @transform_0(%arg0: i32) -> (i32, i32) {
    %c0_i32 = arith.constant 0 : i32
    %c0_i32_0 = arith.constant 0 : i32
    return %arg0, %c0_i32 : i32, i32
  }
  func.func @transform_1(%arg0: i32) -> (i32, i32) {
    %c0_i32 = arith.constant 0 : i32
    %c0_i32_0 = arith.constant 0 : i32
    %c0_i32_1 = arith.constant 0 : i32
    return %c0_i32, %c0_i32_0 : i32, i32
  }
  func.func @transform_2(%arg0: i32) -> (i32, i32) {
    %c0_i32 = arith.constant 0 : i32
    %c0_i32_0 = arith.constant 0 : i32
    %c0_i32_1 = arith.constant 0 : i32
    return %c0_i32, %c0_i32_0 : i32, i32
  }
  func.func @transform_3(%arg0: i32) -> (i32, i32) {
    %c0_i32 = arith.constant 0 : i32
    %c0_i32_0 = arith.constant 0 : i32
    %c0_i32_1 = arith.constant 0 : i32
    return %c0_i32, %c0_i32_0 : i32, i32
  }
  func.func @transform_4(%arg0: i32) -> (i32, i32) {
    %c0_i32 = arith.constant 0 : i32
    %c0_i32_0 = arith.constant 0 : i32
    %c0_i32_1 = arith.constant 0 : i32
    return %c0_i32, %c0_i32_0 : i32, i32
  }
  func.func @transform_5(%arg0: i32) -> (i32, i32) {
    %c0_i32 = arith.constant 0 : i32
    %c0_i32_0 = arith.constant 0 : i32
    %c0_i32_1 = arith.constant 0 : i32
    return %c0_i32, %c0_i32_0 : i32, i32
  }
  func.func @transform_6(%arg0: i32) -> (i32, i32) {
    %c0_i32 = arith.constant 0 : i32
    %c0_i32_0 = arith.constant 0 : i32
    %c0_i32_1 = arith.constant 0 : i32
    return %c0_i32, %c0_i32_0 : i32, i32
  }
  func.func @transform_7(%arg0: i32) -> (i32, i32) {
    %c0_i32 = arith.constant 0 : i32
    %c0_i32_0 = arith.constant 0 : i32
    return %arg0, %c0_i32 : i32, i32
  }
}

</mosaic_0001>

<bundles_post_ra>
// kernel: tweet_regressor_forward.1
= control target key start
LH: loop header
LB: loop body
LE: loop exit
PB: predicated region body
PF: predicated region fallthrough
CT: control target
= control target key end

     0   :  { %vm171_vm0 = vcmask 523264   ;;  %vm272_vm1 = vcmask 130048   ;;  %vm300_vm2 = vcmask 7168   ;;  %s588_s1 = inlined_call_operand.vmem [shape: f32[256,64], index: 1, kind: input, shape index: {}]   ;;  %s589_s0 = inlined_call_operand.vmem [shape: f32[16,256], index: 0, kind: input, shape index: {}]   ;;  %s590_s3 = inlined_call_operand.vmem [shape: f32[64,16], index: 3, kind: input, shape index: {}]   ;;  %s591_s2 = inlined_call_operand.vmem [shape: f32[1,64], index: 2, kind: input, shape index: {}]   ;;  %s592_s6 = inlined_call_operand.<no memory space> [shape: f32[1,1], index: 6, kind: input, shape index: {}]   ;;  %s593_s4 = inlined_call_operand.vmem [shape: f32[1,16], index: 4, kind: input, shape index: {}]   ;;  %s594_s5 = inlined_call_operand.vmem [shape: f32[1,16], index: 5, kind: input, shape index: {}]   ;;  %s595_s7 = inlined_call_operand.vmem [shape: f32[16,1], index: 7, kind: output, shape index: {}]  }
   0x1   :  { %v63_v0 = vld [vmem:[%s588_s1 + $0xf8] sm:$0xff]  ;;  %v62_v2 = vld [vmem:[%s588_s1 + $0xf0] sm:$0xff]  ;;  %v61_v4 = vld [vmem:[%s588_s1 + $0xe8] sm:$0xff]  ;;  %v12_v63 = vstv %s592_s6 }
   0x2   :  { %v47_v1 = vld [vmem:[%s588_s1 + $0x78] sm:$0xff]  ;;  %315 = vmatprep.subr.mxu0 %v63_v0  ;;  %v46_v3 = vld [vmem:[%s588_s1 + $0x70] sm:$0xff]  ;;  %v45_v5 = vld [vmem:[%s588_s1 + $0x68] sm:$0xff]  ;;  %13 = vst [vmem:[#allocation2] sm:$0x1] %v12_v63 }
   0x3   :  { %316 = vmatpush3.msra.mxu0 %v47_v1  ;;  %v60_v6 = vld [vmem:[%s588_s1 + $0xe0] sm:$0xff]  ;;  %v59_v8 = vld [vmem:[%s588_s1 + $0xd8] sm:$0xff]  ;;  %v58_v10 = vld [vmem:[%s588_s1 + $0xd0] sm:$0xff] }
   0x4   :  { %317 = vmatprep.subr.mxu0 %v62_v2  ;;  %v44_v7 = vld [vmem:[%s588_s1 + $0x60] sm:$0xff]  ;;  %v43_v9 = vld [vmem:[%s588_s1 + $0x58] sm:$0xff]  ;;  %v42_v11 = vld [vmem:[%s588_s1 + $0x50] sm:$0xff] }
   0x5   :  { %318 = vmatpush3.msra.mxu0 %v46_v3  ;;  %v57_v12 = vld [vmem:[%s588_s1 + $0xc8] sm:$0xff]  ;;  %v56_v15 = vld [vmem:[%s588_s1 + $0xc0] sm:$0xff]  ;;  %v55_v17 = vld [vmem:[%s588_s1 + $0xb8] sm:$0xff] }
   0x6   :  { %319 = vmatprep.subr.mxu0 %v61_v4  ;;  %v29_v13 = vld [vmem:[%s589_s0 + $0x8] sm:$0xff]  ;;  %v40_v16 = vld [vmem:[%s588_s1 + $0x40] sm:$0xff]  ;;  %v39_v18 = vld [vmem:[%s588_s1 + $0x38] sm:$0xff] }
   0x7   :  { %320 = vmatpush3.msra.mxu0 %v45_v5  ;;  %v41_v14 = vld [vmem:[%s588_s1 + $0x48] sm:$0xff]  ;;  %135 = vmatprep.mubr.f32.mxu0 %v29_v13  ;;  %v54_v19 = vld [vmem:[%s588_s1 + $0xb0] sm:$0xff]  ;;  %v52_v23 = vld [vmem:[%s588_s1 + $0xa0] sm:$0xff] }
   0x8   :  { %321 = vmatprep.subr.mxu0 %v60_v6  ;;  %v38_v20 = vld [vmem:[%s588_s1 + $0x30] sm:$0xff]  ;;  %v53_v21 = vld [vmem:[%s588_s1 + $0xa8] sm:$0xff]  ;;  %v36_v24 = vld [vmem:[%s588_s1 + $0x20] sm:$0xff] }
   0x9   :  { %322 = vmatpush3.msra.mxu0 %v44_v7  ;;  %v37_v22 = vld [vmem:[%s588_s1 + $0x28] sm:$0xff]  ;;  %v51_v25 = vld [vmem:[%s588_s1 + $0x98] sm:$0xff]  ;;  %v50_v27 = vld [vmem:[%s588_s1 + $0x90] sm:$0xff] }
   0xa   :  { %323 = vmatprep.subr.mxu0 %v59_v8  ;;  %v35_v26 = vld [vmem:[%s588_s1 + $0x18] sm:$0xff]  ;;  %v34_v28 = vld [vmem:[%s588_s1 + $0x10] sm:$0xff]  ;;  %v49_v29 = vld [vmem:[%s588_s1 + $0x88] sm:$0xff] }
   0xb   :  { %324 = vmatpush3.msra.mxu0 %v43_v9  ;;  %v33_v30 = vld [vmem:[%s588_s1 + $0x8] sm:$0xff]  ;;  %v48_v31 = vld [vmem:[%s588_s1 + $0x80] sm:$0xff]  ;;  %v31_v34 = vld [vmem:[%s589_s0 + $0x18] sm:$0xff] }
   0xc   :  { %325 = vmatprep.subr.mxu0 %v58_v10  ;;  %v32_v32 = vld [vmem:[%s588_s1] sm:$0xff]  ;;  %v30_v35 = vld [vmem:[%s589_s0 + $0x10] sm:$0xff]  ;;  %v163_v36 = vld [vmem:[%s590_s3 + $0x38] sm:$0xff] }
   0xd   :  { %326 = vmatpush3.msra.mxu0 %v42_v11  ;;  %v28_v33 = vld [vmem:[%s589_s0] sm:$0xff]  ;;  %363 = vmatprep.subr.mxu1 %v163_v36  ;;  %v162_v37 = vld [vmem:[%s590_s3 + $0x30] sm:$0xff]  ;;  %v161_v38 = vld [vmem:[%s590_s3 + $0x28] sm:$0xff] }
   0xe   :  { %327 = vmatprep.subr.mxu0 %v57_v12  ;;  %364 = vmatpush3.msra.mxu1 %v163_v36  ;;  %v160_v39 = vld [vmem:[%s590_s3 + $0x20] sm:$0xff]  ;;  %v159_v40 = vld [vmem:[%s590_s3 + $0x18] sm:$0xff]  ;;  %v158_v41 = vld [vmem:[%s590_s3 + $0x10] sm:$0xff] }
   0xf   :  { %328 = vmatpush3.msra.mxu0 %v41_v14  ;;  %365 = vmatprep.subr.mxu1 %v162_v37  ;;  %v157_v42 = vld [vmem:[%s590_s3 + $0x8] sm:$0xff]  ;;  %v156_v43 = vld [vmem:[%s590_s3] sm:$0xff] }
  0x10   :  { %329 = vmatprep.subr.mxu0 %v56_v15  ;;  %366 = vmatpush3.msra.mxu1 %v162_v37  ;;  %v307_v45 = vld [vmem:[%s591_s2] ss:$0 sm:$0xff] }
  0x11   :  { %330 = vmatpush3.msra.mxu0 %v40_v16  ;;  %367 = vmatprep.subr.mxu1 %v161_v38  ;;  %v308_v0 = vld [vmem:[%s593_s4] ss:$0 sm:$0xff] }
  0x12   :  { %331 = vmatprep.subr.mxu0 %v55_v17  ;;  %368 = vmatpush3.msra.mxu1 %v161_v38  ;;  %v311_v15 = vld [vmem:[%s594_s5] ss:$0 sm:$0xff] }
  0x13   :  { %332 = vmatpush3.msra.mxu0 %v39_v18  ;;  %369 = vmatprep.subr.mxu1 %v160_v39 }
  0x14   :  { %333 = vmatprep.subr.mxu0 %v54_v19  ;;  %370 = vmatpush3.msra.mxu1 %v160_v39 }
  0x15   :  { %334 = vmatpush3.msra.mxu0 %v38_v20  ;;  %371 = vmatprep.subr.mxu1 %v159_v40  ;;  %v312_v20 = vld [vmem:[#allocation2] ss:$0 sm:$0xff] }
  0x16   :  { %335 = vmatprep.subr.mxu0 %v53_v21  ;;  %372 = vmatpush3.msra.mxu1 %v159_v40 }
  0x17   :  { %336 = vmatpush3.msra.mxu0 %v37_v22  ;;  %373 = vmatprep.subr.mxu1 %v158_v41 }
  0x18   :  { %337 = vmatprep.subr.mxu0 %v52_v23  ;;  %374 = vmatpush3.msra.mxu1 %v158_v41 }
  0x19   :  { %338 = vmatpush3.msra.mxu0 %v36_v24  ;;  %375 = vmatprep.subr.mxu1 %v157_v42 }
  0x1a   :  { %339 = vmatprep.subr.mxu0 %v51_v25  ;;  %376 = vmatpush3.msra.mxu1 %v157_v42 }
  0x1b   :  { %340 = vmatpush3.msra.mxu0 %v35_v26  ;;  %377 = vmatprep.subr.mxu1 %v156_v43 }
  0x1c   :  { %341 = vmatprep.subr.mxu0 %v50_v27  ;;  %378 = vmatpush3.msra.mxu1 %v156_v43 }
  0x1d   :  { %342 = vmatpush3.msra.mxu0 %v34_v28 }
  0x1e   :  { %343 = vmatprep.subr.mxu0 %v49_v29 }
  0x1f   :  { %344 = vmatpush3.msra.mxu0 %v33_v30 }
  0x20   :  { %345 = vmatprep.subr.mxu0 %v48_v31 }
  0x21   :  { %346 = vmatpush3.msra.mxu0 %v32_v32 }
  0x22   :  { %136 = vmatmul.mubr.f32.vlgmr.msra.gmra.mxu0 %v28_v33 }
  0x23   :  { %140 = vmatprep.mubr.f32.mxu0 %v31_v34 }
  0x26   :  { %141 = vmatmul.mubr.f32.gmra.mxu0 %v30_v35 }
  0xe2   :  { %v347_v44 = vpop.f32.mrf.mxu0 }
  0xe4   :  { %v348_v46 = vpop.f32.mrf.mxu0 }
  0xe5   :  { %v349_v47 = vadd.f32 %v348_v46, %v347_v44 }
  0xe6   :  { %v350_v48 = vpop.f32.mrf.mxu0 }
  0xe7   :  { %v138_v49 = vadd.f32 %v349_v47, %v307_v45 }
  0xe8   :  { %v351_v50 = vpop.f32.mrf.mxu0 }
  0xe9   :  { %v148_v51 = vmul.f32 0.70710677, %v138_v49  ;;  %v352_v52 = vadd.f32 %v351_v50, %v350_v48  ;;  %v146_v56 = vmul.f32 0.5, %v138_v49 }
  0xeb   :  { %382 = verf.f32 %v148_v51  ;;  %v143_v53 = vadd.f32 %v352_v52, %v307_v45 }
  0xed   :  { %v149_v54 = vmul.f32 0.70710677, %v143_v53  ;;  %v147_v60 = vmul.f32 0.5, %v143_v53 }
  0xef   :  { %384 = verf.f32 %v149_v54 }
  0xf8   :  { %v383_v55 = vpop.eup %382 }
  0xf9   :  { %v152_v57 = vadd.f32 1.0, %v383_v55 }
  0xfb   :  { %v154_v58 = vmul.f32 %v152_v57, %v146_v56 }
  0xfc   :  { %v385_v59 = vpop.eup %384 }
  0xfd   :  { %v153_v61 = vadd.f32 1.0, %v385_v59  ;;  %379 = vmatprep.mubr.msk.f32.mxu1 %vm171_vm0, %v154_v58 }
  0xff   :  { %v155_v62 = vmul.f32 %v153_v61, %v147_v60 }
 0x101   :  { %380 = vmatmul.mubr.msk.f32.vlgmr.msra.gmra.mxu1 %vm171_vm0, %v155_v62 }
 0x1c1   :  { %v381_v1 = vpop.f32.mrf.mxu1 }
 0x1c2   :  { %v250_v2 = vadd.f32 %v381_v1, %v308_v0 }
 0x1c3   :  { %v244_v3 = vpop.f32.mrf.mxu1 }
 0x1c4   :  { %v256_v4 = vmul.f32 0.70710677, %v250_v2  ;;  %v245_v5 = vadd.f32 %v308_v0, %v244_v3  ;;  %v254_v10 = vmul.f32 0.5, %v250_v2 }
 0x1c6   :  { %386 = verf.f32 %v256_v4  ;;  %v255_v6 = vmul.f32 0.70710677, %v245_v5  ;;  %v253_v11 = vmul.f32 0.5, %v245_v5 }
 0x1c8   :  { %388 = verf.f32 %v255_v6 }
 0x1d3   :  { %v387_v7 = vpop.eup %386 }
 0x1d4   :  { %v260_v8 = vadd.f32 1.0, %v387_v7 }
 0x1d5   :  { %v389_v9 = vpop.eup %388 }
 0x1d6   :  { %v259_v12 = vadd.f32 1.0, %v389_v9  ;;  %v262_v14 = vmul.f32 %v260_v8, %v254_v10 }
 0x1d8   :  { %v261_v13 = vmul.f32 %v259_v12, %v253_v11  ;;  %v271_v18 = vmul.f32 %v311_v15, %v262_v14 }
 0x1da   :  { %v270_v16 = vmul.f32 %v311_v15, %v261_v13  ;;  %v276_v19 = vsel %vm272_vm1, %v271_v18, 0.0 }
 0x1dc   :  { %v273_v17 = vsel %vm272_vm1, %v270_v16, 0.0 }
 0x1dd   :  { %274 = vadd.xlane.f32.xlu0 %v273_v17 }
 0x1e1   :  { %277 = vadd.xlane.f32.xlu0 %v276_v19 }
 0x266   :  { %v275_v21 = vpop.xlane.xlu0 %274 }
 0x267   :  { %v286_v22 = vadd.f32 %v312_v20, %v275_v21 }
 0x269   :  { %v313_v23 = vmul.f32 -1.442695, %v286_v22 }
 0x26a   :  { %v278_v24 = vpop.xlane.xlu0 %277 }
 0x26b   :  { %390 = vpow2.f32 %v313_v23  ;;  %v287_v25 = vadd.f32 %v312_v20, %v278_v24 }
 0x26d   :  { %v314_v26 = vmul.f32 -1.442695, %v287_v25 }
 0x26f   :  { %392 = vpow2.f32 %v314_v26 }
 0x278   :  { %v391_v27 = vpop.eup %390 }
 0x279   :  { %v294_v28 = vadd.f32 1.0, %v391_v27 }
 0x27b   :  { %394 = vrcp.f32 %v294_v28 }
 0x27c   :  { %v393_v29 = vpop.eup %392 }
 0x27d   :  { %v295_v30 = vadd.f32 1.0, %v393_v29 }
 0x27f   :  { %396 = vrcp.f32 %v295_v30 }
 0x288   :  { %v395_v31 = vpop.eup %394 }
 0x289   :  { %301 = vst.msk [vmem:[%s595_s7] sm:$0xff] %vm300_vm2, %v395_v31 }
 0x28c   :  { %v397_v32 = vpop.eup %396 }
 0x28d   :  { %302 = vst.msk [vmem:[%s595_s7 + $0x8] sm:$0xff] %vm300_vm2, %v397_v32 }

</bundles_post_ra>
